<compile_context>
chip_gen: v6e
topology: v6e:2x2x1
jax: 0.10.0
libtpu: 0.0.40
codegen_flags: <defaults>
</compile_context>

<pallas_src>
import functools

import jax
import jax.numpy as jnp
from jax.experimental import pallas as pl
from jax.experimental.pallas import tpu as pltpu


def _round_up(x: int, m: int) -> int:
    return (x + m - 1) // m * m


def _largest_tile(dim: int, unit: int, cap: int) -> int:
    """Largest multiple of `unit` that divides `dim` and is <= cap (>= unit)."""
    best = unit
    t = unit
    limit = min(cap, dim)
    while t <= limit:
        if dim % t == 0:
            best = t
        t += unit
    return best


@functools.lru_cache(maxsize=1)
def _chip_config():
    """Tile caps / VMEM limit / core count per TPU generation."""
    try:
        kind = jax.devices()[0].device_kind.lower()
    except Exception:  # pragma: no cover
        kind = ""
    if "v6" in kind:  # v6e / Trillium: 128 MiB VMEM, ~650 flops/byte roofline
        return dict(tm_max=1024, tn_max=2048, tk_max=2048,
                    vmem_limit=96 * 1024 * 1024, cores=1)
    if any(s in kind for s in ("v5 lite", "v5e", "v5lite", "v5", "v4", "v3", "v2")):
        # v5e-class: 128 MiB VMEM but low HBM BW; 512x512 bf16 already clears
        # its ~240 flops/byte roofline.  Raise scoped VMEM off the 16 MiB default.
        return dict(tm_max=512, tn_max=512, tk_max=1024,
                    vmem_limit=64 * 1024 * 1024, cores=1)
    # v7x or unknown: only 64 MiB VMEM, 2 TensorCores, 3.2 TB/s HBM.
    # ~768 tiles (<~13 MiB double-buffered working set) are compute-bound.
    return dict(tm_max=768, tn_max=768, tk_max=1024,
                vmem_limit=48 * 1024 * 1024, cores=2)


def _linear_kernel_f32out(x_ref, w_ref, b_ref, o_ref):
    """f32 output: accumulate directly into the resident output block."""
    k = pl.program_id(2)

    @pl.when(k == 0)
    def _():
        o_ref[...] = jnp.zeros_like(o_ref)

    o_ref[...] += jnp.dot(x_ref[...], w_ref[...],
                          preferred_element_type=jnp.float32)

    @pl.when(k == pl.num_programs(2) - 1)
    def _():
        o_ref[...] = o_ref[...] + b_ref[...]


def _linear_kernel_scratch(x_ref, w_ref, b_ref, o_ref, acc_ref):
    """Non-f32 output: f32 VMEM accumulator, cast once in the finalize branch."""
    k = pl.program_id(2)

    @pl.when(k == 0)
    def _():
        acc_ref[...] = jnp.zeros_like(acc_ref)

    acc_ref[...] += jnp.dot(x_ref[...], w_ref[...],
                            preferred_element_type=jnp.float32)

    @pl.when(k == pl.num_programs(2) - 1)
    def _():
        o_ref[...] = (acc_ref[...] + b_ref[...]).astype(o_ref.dtype)


@functools.partial(jax.jit, static_argnames=("force_pallas",))
def apply_forward(g_features, weight, bias, *, force_pallas=False):
    """Apply(module).forward where module == Linear(weight, bias).

    g_features: [B, S, H_in]   (feature-last layout)
    weight:     [H_in, H_out]  (PyTorch nn.Linear weight, transposed)
    bias:       [H_out]
    returns:    [B, S, H_out]
    """
    B, S, H_in = g_features.shape
    H_out = weight.shape[1]
    M, K, N = B * S, H_in, H_out
    out_dtype = g_features.dtype

    # Tiny problems: per-grid-step overhead + (8,128) padding dominate; use XLA.
    if not force_pallas and max(M, K, N) <= 256:
        return (g_features @ weight + bias).astype(out_dtype)

    cfg = _chip_config()

    # Base-granularity padding only (<=15 rows / <=127 cols of zeros):
    # bf16 packs 16 rows per vreg -> M to 16; lanes -> N, K to 128.
    M_pad = _round_up(M, 16)
    N_pad = _round_up(N, 128)
    K_pad = _round_up(K, 128)

    # Tiles are divisors of the padded dims -> exact grid, no edge blocks,
    # no tile-multiple padding waste.  K edge correctness: tk divides K_pad
    # and the K pad region is explicitly zero.
    tm = _largest_tile(M_pad, 16, cfg["tm_max"])
    tn = _largest_tile(N_pad, 128, cfg["tn_max"])
    tk = _largest_tile(K_pad, 128, cfg["tk_max"])

    # Keep both TensorCores busy on megacore chips (v7x): need >= 2 blocks
    # along a "parallel" axis.
    if cfg["cores"] >= 2 and M_pad // tm == 1 and N_pad // tn == 1:
        if N_pad >= 256:
            tn = _largest_tile(N_pad, 128, N_pad // 2)
        elif M_pad >= 32:
            tm = _largest_tile(M_pad, 16, M_pad // 2)

    # bf16 inputs (MXU-native), f32 accumulation, f32 bias.
    x2d = g_features.reshape(M, K).astype(jnp.bfloat16)
    w2d = weight.astype(jnp.bfloat16)
    b2d = bias.reshape(1, N).astype(jnp.float32)
    if (M_pad, K_pad) != (M, K):
        x2d = jnp.pad(x2d, ((0, M_pad - M), (0, K_pad - K)))
    if (K_pad, N_pad) != (K, N):
        w2d = jnp.pad(w2d, ((0, K_pad - K), (0, N_pad - N)))
    if N_pad != N:
        b2d = jnp.pad(b2d, ((0, 0), (0, N_pad - N)))

    grid = (M_pad // tm, N_pad // tn, K_pad // tk)
    grid_m, grid_n, _ = grid

    out_itemsize = jnp.dtype(out_dtype).itemsize
    cost = pl.CostEstimate(
        flops=2 * M_pad * N_pad * K_pad,
        transcendentals=0,
        bytes_accessed=(2 * M_pad * K_pad * grid_n      # x re-read per j
                        + 2 * K_pad * N_pad * grid_m    # w re-read per i
                        + 4 * N_pad * grid_m            # bias
                        + out_itemsize * M_pad * N_pad),
    )

    if out_dtype == jnp.float32:
        kernel = _linear_kernel_f32out
        scratch = []                                   # accumulate in o_ref
    else:
        kernel = _linear_kernel_scratch
        scratch = [pltpu.VMEM((tm, tn), jnp.float32)]

    out2d = pl.pallas_call(
        kernel,
        out_shape=jax.ShapeDtypeStruct((M_pad, N_pad), out_dtype),
        grid_spec=pltpu.PrefetchScalarGridSpec(
            num_scalar_prefetch=0,
            grid=grid,
            in_specs=[
                pl.BlockSpec((tm, tk), lambda i, j, k: (i, k)),   # x tile
                pl.BlockSpec((tk, tn), lambda i, j, k: (k, j)),   # w tile
                pl.BlockSpec((1, tn), lambda i, j, k: (0, j)),    # bias tile
            ],
            out_specs=pl.BlockSpec((tm, tn), lambda i, j, k: (i, j)),
            scratch_shapes=scratch,
        ),
        compiler_params=pltpu.CompilerParams(
            dimension_semantics=("parallel", "parallel", "arbitrary"),
            vmem_limit_bytes=cfg["vmem_limit"],
        ),
        cost_estimate=cost,
    )(x2d, w2d, b2d)

    return out2d[:M, :N].reshape(B, S, N)


if __name__ == "__main__":
    key = jax.random.PRNGKey(0)
    k_x, k_w, k_b = jax.random.split(key, 3)

    # Small demo: Apply(nn.Linear(32, 32)) on [B=2, S=8, H=32] token features.
    B, S, H_in, H_out = 2, 8, 32, 32
    g_features = jax.random.normal(k_x, (B, S, H_in), dtype=jnp.float32)
    weight = jax.random.normal(k_w, (H_in, H_out), dtype=jnp.float32) * 0.02
    bias = jax.random.normal(k_b, (H_out,), dtype=jnp.float32) * 0.02

    # Force the Pallas path so the kernel is actually exercised at this size.
    out = apply_forward(g_features, weight, bias, force_pallas=True)
    jax.block_until_ready(out)
    ref = g_features @ weight + bias
    assert out.shape == (B, S, H_out)
    assert jnp.allclose(out, ref, atol=2e-2, rtol=2e-2)  # bf16 inputs, f32 accum

    # Larger shape: multi-block grid, non-128-multiple N, no K padding,
    # natural (non-forced) Pallas dispatch.
    B2, S2, Hi2, Ho2 = 4, 128, 384, 520
    kx2, kw2, kb2 = jax.random.split(jax.random.PRNGKey(1), 3)
    x2 = jax.random.normal(kx2, (B2, S2, Hi2), dtype=jnp.float32)
    w2 = jax.random.normal(kw2, (Hi2, Ho2), dtype=jnp.float32) * 0.02
    b2 = jax.random.normal(kb2, (Ho2,), dtype=jnp.float32) * 0.02
    out2 = apply_forward(x2, w2, b2)
    jax.block_until_ready(out2)
    ref2 = x2 @ w2 + b2
    assert out2.shape == (B2, S2, Ho2)
    assert jnp.allclose(out2, ref2, atol=3e-2, rtol=3e-2)

    print("KERNEL_OK")
</pallas_src>

<mosaic_0001>
module attributes {stable_mosaic.version = 11 : i64} {
  func.func @_linear_kernel_f32out(%arg0: i32, %arg1: i32, %arg2: i32, %arg3: memref<16x128xbf16, #tpu.memory_space<vmem>>, %arg4: memref<128x128xbf16, #tpu.memory_space<vmem>>, %arg5: memref<1x128xf32, #tpu.memory_space<vmem>>, %arg6: memref<16x128xf32, #tpu.memory_space<vmem>>) attributes {dimension_semantics = [#tpu.dimension_semantics<parallel>, #tpu.dimension_semantics<parallel>, #tpu.dimension_semantics<arbitrary>], iteration_bounds = array<i64: 1, 1, 1>, scalar_prefetch = 0 : i64, scratch_operands = 0 : i64, tpu.core_type = #tpu.core_type<tc>, window_params = [{transform_indices = @transform_0, window_bounds = array<i64: 16, 128>}, {transform_indices = @transform_1, window_bounds = array<i64: 128, 128>}, {transform_indices = @transform_2, window_bounds = array<i64: 1, 128>}, {transform_indices = @transform_3, window_bounds = array<i64: 16, 128>}]} {
    %c0_i32 = arith.constant 0 : i32
    %0 = arith.cmpi eq, %arg2, %c0_i32 : i32
    %1 = arith.extui %0 : i1 to i32
    %c0_i32_0 = arith.constant 0 : i32
    %2 = arith.cmpi ne, %1, %c0_i32_0 : i32
    scf.if %2 {
      %cst_10 = arith.constant 0.000000e+00 : f32
      %12 = vector.broadcast %cst_10 : f32 to vector<16x128xf32>
      %c0_11 = arith.constant 0 : index
      %c0_12 = arith.constant 0 : index
      %13 = vector.load %arg6[%c0_11, %c0_12] : memref<16x128xf32, #tpu.memory_space<vmem>>, vector<16x128xf32>
      tpu.vector_store %arg6[%c0_11, %c0_12], %12 {strides = array<i32>} : memref<16x128xf32, #tpu.memory_space<vmem>>, vector<16x128xf32>,
    } else {
    }
    %c0 = arith.constant 0 : index
    %c0_1 = arith.constant 0 : index
    %3 = vector.load %arg6[%c0, %c0_1] : memref<16x128xf32, #tpu.memory_space<vmem>>, vector<16x128xf32>
    %c0_2 = arith.constant 0 : index
    %c0_3 = arith.constant 0 : index
    %4 = vector.load %arg3[%c0_2, %c0_3] : memref<16x128xbf16, #tpu.memory_space<vmem>>, vector<16x128xbf16>
    %c0_4 = arith.constant 0 : index
    %c0_5 = arith.constant 0 : index
    %5 = vector.load %arg4[%c0_4, %c0_5] : memref<128x128xbf16, #tpu.memory_space<vmem>>, vector<128x128xbf16>
    %cst = arith.constant dense<0.000000e+00> : vector<16x128xf32>
    %6 = tpu.matmul %4, %5, %cst {dimension_numbers = #tpu.dot_dimension_numbers<[1], [0], [0], [1], [0, 0, 1, 1], [], []>} : vector<16x128xbf16>, vector<128x128xbf16>, vector<16x128xf32> -> vector<16x128xf32>
    %7 = arith.addf %3, %6 : vector<16x128xf32>
    %c0_6 = arith.constant 0 : index
    %c0_7 = arith.constant 0 : index
    %8 = vector.load %arg6[%c0_6, %c0_7] : memref<16x128xf32, #tpu.memory_space<vmem>>, vector<16x128xf32>
    tpu.vector_store %arg6[%c0_6, %c0_7], %7 {strides = array<i32>} : memref<16x128xf32, #tpu.memory_space<vmem>>, vector<16x128xf32>,
    %c0_i32_8 = arith.constant 0 : i32
    %9 = arith.cmpi eq, %arg2, %c0_i32_8 : i32
    %10 = arith.extui %9 : i1 to i32
    %c0_i32_9 = arith.constant 0 : i32
    %11 = arith.cmpi ne, %10, %c0_i32_9 : i32
    scf.if %11 {
      %c0_10 = arith.constant 0 : index
      %c0_11 = arith.constant 0 : index
      %12 = vector.load %arg6[%c0_10, %c0_11] : memref<16x128xf32, #tpu.memory_space<vmem>>, vector<16x128xf32>
      %c0_12 = arith.constant 0 : index
      %c0_13 = arith.constant 0 : index
      %13 = vector.load %arg5[%c0_12, %c0_13] : memref<1x128xf32, #tpu.memory_space<vmem>>, vector<1x128xf32>
      %14 = vector.broadcast %13 : vector<1x128xf32> to vector<16x128xf32>
      %15 = arith.addf %12, %14 : vector<16x128xf32>
      %c0_14 = arith.constant 0 : index
      %c0_15 = arith.constant 0 : index
      %16 = vector.load %arg6[%c0_14, %c0_15] : memref<16x128xf32, #tpu.memory_space<vmem>>, vector<16x128xf32>
      tpu.vector_store %arg6[%c0_14, %c0_15], %15 {strides = array<i32>} : memref<16x128xf32, #tpu.memory_space<vmem>>, vector<16x128xf32>,
    } else {
    }
    return
  }
  func.func @transform_0(%arg0: i32, %arg1: i32, %arg2: i32) -> (i32, i32) {
    %c0_i32 = arith.constant 0 : i32
    return %arg0, %arg2 : i32, i32
  }
  func.func @transform_1(%arg0: i32, %arg1: i32, %arg2: i32) -> (i32, i32) {
    %c0_i32 = arith.constant 0 : i32
    return %arg2, %arg1 : i32, i32
  }
  func.func @transform_2(%arg0: i32, %arg1: i32, %arg2: i32) -> (i32, i32) {
    %c0_i32 = arith.constant 0 : i32
    %c0_i32_0 = arith.constant 0 : i32
    return %c0_i32, %arg1 : i32, i32
  }
  func.func @transform_3(%arg0: i32, %arg1: i32, %arg2: i32) -> (i32, i32) {
    %c0_i32 = arith.constant 0 : i32
    return %arg0, %arg1 : i32, i32
  }
}

</mosaic_0001>

<bundles_post_ra>
// kernel: apply_forward.1
= control target key start
LH: loop header
LB: loop body
LE: loop exit
PB: predicated region body
PF: predicated region fallthrough
CT: control target
= control target key end

     0   :  { %v210_v0 = vmov 0.0   ;;  %vm211_vm0 = vmmov 0   ;;  %s268_s1 = inlined_call_operand.vmem [shape: bf16[128,128], index: 1, kind: input, shape index: {}]   ;;  %s269_s0 = inlined_call_operand.vmem [shape: bf16[16,128], index: 0, kind: input, shape index: {}]   ;;  %s270_s2 = inlined_call_operand.vmem [shape: f32[1,128], index: 2, kind: input, shape index: {}]   ;;  %s271_s3 = inlined_call_operand.vmem [shape: f32[16,128], index: 3, kind: output, shape index: {}]  }
   0x1   :  { %179 = vmatprep.subr.bf16.mxu0 %v210_v0  ;;  %v201_v1 = vld [vmem:[%s268_s1 + $0x38] sm:$0xff]   ;;  %195 = vmatprep.mubr.msk.bf16.mxu0 %vm211_vm0, %v210_v0  ;;  %v202_v2 = vld [vmem:[%s268_s1 + $0x30] sm:$0xff]   ;;  %v203_v3 = vld [vmem:[%s268_s1 + $0x28] sm:$0xff]  }
   0x2   :  { %180 = vmatpush3.bf16.msra.mxu0 %v201_v1  ;;  %v204_v4 = vld [vmem:[%s268_s1 + $0x20] sm:$0xff]   ;;  %v205_v5 = vld [vmem:[%s268_s1 + $0x18] sm:$0xff]   ;;  %v206_v6 = vld [vmem:[%s268_s1 + $0x10] sm:$0xff]  }
   0x3   :  { %181 = vmatprep.subr.bf16.mxu0 %v210_v0  ;;  %v207_v7 = vld [vmem:[%s268_s1 + $0x8] sm:$0xff]   ;;  %v208_v8 = vld [vmem:[%s268_s1] sm:$0xff]  }
   0x4   :  { %v209_v9 = vld [vmem:[%s269_s0] sm:$0xff]  }
   0x5   :  { %v169_v11 = vld [vmem:[%s270_s2] ss:$0 sm:$0xff] }
   0x6   :  { %182 = vmatpush3.bf16.msra.mxu0 %v202_v2 }
   0x7   :  { %183 = vmatprep.subr.bf16.mxu0 %v210_v0 }
   0xa   :  { %184 = vmatpush3.bf16.msra.mxu0 %v203_v3 }
   0xb   :  { %185 = vmatprep.subr.bf16.mxu0 %v210_v0 }
   0xe   :  { %186 = vmatpush3.bf16.msra.mxu0 %v204_v4 }
   0xf   :  { %187 = vmatprep.subr.bf16.mxu0 %v210_v0 }
  0x12   :  { %188 = vmatpush3.bf16.msra.mxu0 %v205_v5 }
  0x13   :  { %189 = vmatprep.subr.bf16.mxu0 %v210_v0 }
  0x16   :  { %190 = vmatpush3.bf16.msra.mxu0 %v206_v6 }
  0x17   :  { %191 = vmatprep.subr.bf16.mxu0 %v210_v0 }
  0x1a   :  { %192 = vmatpush3.bf16.msra.mxu0 %v207_v7 }
  0x1b   :  { %193 = vmatprep.subr.bf16.mxu0 %v210_v0 }
  0x1e   :  { %194 = vmatpush3.bf16.msra.mxu0 %v208_v8 }
  0x21   :  { %196 = vmatmul.mubr.bf16.vlgmr.msra.gmra.mxu0 %v209_v9 }
  0xe1   :  { %v129_v10 = vpop.f32.mrf.mxu0 }
  0xe2   :  { %v152_v13 = vadd.f32 %v169_v11, %v129_v10 }
  0xe3   :  { %v197_v12 = vpop.f32.mrf.mxu0 }
  0xe4   :  { %154 = vst [vmem:[%s271_s3] sm:$0xff] %v152_v13 }
  0xe5   :  { %v132_v14 = vpop.f32.mrf.mxu0 }
  0xe6   :  { %v153_v16 = vadd.f32 %v169_v11, %v132_v14 }
  0xe7   :  { %v198_v15 = vpop.f32.mrf.mxu0 }
  0xe8   :  { %155 = vst [vmem:[%s271_s3 + $0x8] sm:$0xff] %v153_v16 }

</bundles_post_ra>
